<compile_context>
chip_gen: v7x
topology: tpu7x:2x2x1
jax: 0.10.0
libtpu: 0.0.40
codegen_flags: <defaults>
</compile_context>

<pallas_src>
import functools

import jax
import jax.numpy as jnp
from jax.experimental import pallas as pl
from jax.experimental.pallas import tpu as pltpu

_PACK = 4        # batch rows packed per 128-lane row (4 * 32 hidden = 128 lanes)
_FEAT = 16       # per-input feature width (y and M are each [B, 16])
_HID = 32        # hidden width of l0 / l1


def _round_up(x, m):
    return ((x + m - 1) // m) * m


def _global_disc_kernel(yp_ref, mp_ref, w0y_ref, w0m_ref, b0_ref,
                        w1_ref, b1_ref, w2_ref, b2_ref, out_ref):
    """Packed MLP: [TBP, 64]x2 -> relu(l0) -> relu(l1) -> l2 -> [TBP, 4].

    Weights are block-diagonal (kron(eye(PACK), W)), so each 128-lane row
    holds PACK independent batch rows processed in lockstep on the MXU/VPU.
    """
    # l0 in split-weight form (equivalent to concat([y, M], -1) @ w0 + b0)
    h = (jnp.dot(yp_ref[...], w0y_ref[...], preferred_element_type=jnp.float32)
         + jnp.dot(mp_ref[...], w0m_ref[...], preferred_element_type=jnp.float32)
         + b0_ref[...])
    h = jnp.maximum(h, 0.0)
    # l1 + ReLU
    h = jnp.dot(h, w1_ref[...], preferred_element_type=jnp.float32) + b1_ref[...]
    h = jnp.maximum(h, 0.0)
    # l2 (no activation); output block is lane-width 4 (one scalar per packed row)
    out_ref[...] = (jnp.dot(h, w2_ref[...], preferred_element_type=jnp.float32)
                    + b2_ref[...])


@functools.partial(jax.jit, static_argnames=("block_rows",))
def global_discriminator_forward(y, M, params, *, block_rows=1024):
    """y: [B, 16], M: [B, 16]  ->  [B, 1]  (float32).

    block_rows = packed rows (groups of 4 batch rows) per grid step.
    """
    w0, b0, w1, b1, w2, b2 = params
    B = y.shape[0]
    f32 = jnp.float32
    y = y.astype(f32)
    M = M.astype(f32)

    # ---- pack 4 batch rows per 128-lane row (free reshape when B % 4 == 0) --
    bp = pl.cdiv(B, _PACK)                              # packed (group) rows needed
    tbp = max(8, _round_up(min(block_rows, bp), 8))     # packed rows per grid step
    bp_pad = _round_up(bp, tbp)                         # padded packed rows
    b_pad = _PACK * bp_pad                              # padded batch rows

    def pack(x):
        if b_pad != B:                                  # pad is a no-op when aligned
            x = jnp.pad(x, ((0, b_pad - B), (0, 0)))
        return x.reshape(bp_pad, _PACK * _FEAT)         # [Bp, 64]

    yp = pack(y)
    mp = pack(M)

    # ---- block-diagonal weights / tiled biases (tiny, amortized over B) ----
    eye = jnp.eye(_PACK, dtype=f32)
    w0y = jnp.kron(eye, w0[:_FEAT, :].astype(f32))      # [64, 128]
    w0m = jnp.kron(eye, w0[_FEAT:, :].astype(f32))      # [64, 128]
    w1b = jnp.kron(eye, w1.astype(f32))                 # [128, 128]
    w2b = jnp.kron(eye, w2.astype(f32))                 # [128, 4]
    b0t = jnp.tile(b0.astype(f32).reshape(1, _HID), (1, _PACK))   # [1, 128]
    b1t = jnp.tile(b1.astype(f32).reshape(1, _HID), (1, _PACK))   # [1, 128]
    b2t = jnp.tile(b2.astype(f32).reshape(1, 1), (1, _PACK))      # [1, 4]

    grid = (bp_pad // tbp,)
    act_spec = lambda w: pl.BlockSpec((tbp, w), lambda i: (i, 0))
    full = lambda a: pl.BlockSpec(a.shape, lambda i: (0,) * a.ndim)

    out_packed = pl.pallas_call(
        _global_disc_kernel,
        out_shape=jax.ShapeDtypeStruct((bp_pad, _PACK), f32),
        grid=grid,
        in_specs=[
            act_spec(_PACK * _FEAT),          # yp  [tbp, 64]
            act_spec(_PACK * _FEAT),          # mp  [tbp, 64]
            full(w0y), full(w0m), full(b0t),
            full(w1b), full(b1t),
            full(w2b), full(b2t),
        ],
        out_specs=pl.BlockSpec((tbp, _PACK), lambda i: (i, 0)),
        compiler_params=pltpu.CompilerParams(
            dimension_semantics=("parallel",)),   # v7x: shard batch tiles over TCs
    )(yp, mp, w0y, w0m, b0t, w1b, b1t, w2b, b2t)

    # [Bp, 4] -> [B_pad, 1] is a free row-major reshape; drop padded tail rows.
    return out_packed.reshape(b_pad, 1)[:B]


def init_params(key):
    """Deterministic init matching PyTorch Linear fan-in uniform scheme.

    Weight shapes stored as [in, out] (transpose of torch's [out, in]).
    """
    def linear(key, fan_in, fan_out):
        kw, kb = jax.random.split(key)
        bound = 1.0 / jnp.sqrt(float(fan_in))
        w = jax.random.uniform(kw, (fan_in, fan_out), jnp.float32, -bound, bound)
        b = jax.random.uniform(kb, (1, fan_out), jnp.float32, -bound, bound)
        return w, b

    k0, k1, k2 = jax.random.split(key, 3)
    w0, b0 = linear(k0, 32, 32)   # l0: Linear(32, 32)
    w1, b1 = linear(k1, 32, 32)   # l1: Linear(32, 32)
    w2, b2 = linear(k2, 32, 1)    # l2: (see TODO above; declared Linear(512, 1))
    return (w0, b0, w1, b1, w2, b2)


def reference_forward(y, M, params):
    """Pure-JAX reference for correctness checking."""
    w0, b0, w1, b1, w2, b2 = params
    h = jnp.concatenate([y, M], axis=1).astype(jnp.float32)
    h = jnp.maximum(h @ w0 + b0, 0.0)
    h = jnp.maximum(h @ w1 + b1, 0.0)
    return h @ w2 + b2


if __name__ == "__main__":
    key = jax.random.PRNGKey(0)
    k_y, k_m, k_p, k_y2, k_m2 = jax.random.split(key, 5)

    params = init_params(k_p)

    # Small shape consistent with the module (a batch of 8 graph embeddings).
    B = 8
    y = jax.random.normal(k_y, (B, 16), jnp.float32)   # global summary half
    M = jax.random.normal(k_m, (B, 16), jnp.float32)   # (pre-)encoded patch half

    out = jax.block_until_ready(global_discriminator_forward(y, M, params))
    ref = reference_forward(y, M, params)
    assert out.shape == (B, 1)
    assert jnp.allclose(out, ref, atol=1e-5, rtol=1e-5)

    # Exercise the multi-tile grid + ragged-batch padding path.
    B2 = 300
    y2 = jax.random.normal(k_y2, (B2, 16), jnp.float32)
    M2 = jax.random.normal(k_m2, (B2, 16), jnp.float32)
    out2 = jax.block_until_ready(
        global_discriminator_forward(y2, M2, params, block_rows=32))
    ref2 = reference_forward(y2, M2, params)
    assert out2.shape == (B2, 1)
    assert jnp.allclose(out2, ref2, atol=1e-5, rtol=1e-5)

    print("KERNEL_OK")
</pallas_src>

<mosaic_0001>
module attributes {stable_mosaic.version = 11 : i64} {
  func.func @_global_disc_kernel(%arg0: i32, %arg1: memref<8x64xf32, #tpu.memory_space<vmem>>, %arg2: memref<8x64xf32, #tpu.memory_space<vmem>>, %arg3: memref<64x128xf32, #tpu.memory_space<vmem>>, %arg4: memref<64x128xf32, #tpu.memory_space<vmem>>, %arg5: memref<1x128xf32, #tpu.memory_space<vmem>>, %arg6: memref<128x128xf32, #tpu.memory_space<vmem>>, %arg7: memref<1x128xf32, #tpu.memory_space<vmem>>, %arg8: memref<128x4xf32, #tpu.memory_space<vmem>>, %arg9: memref<1x4xf32, #tpu.memory_space<vmem>>, %arg10: memref<8x4xf32, #tpu.memory_space<vmem>>) attributes {dimension_semantics = [#tpu.dimension_semantics<parallel>], iteration_bounds = array<i64: 1>, scalar_prefetch = 0 : i64, scratch_operands = 0 : i64, tpu.core_type = #tpu.core_type<tc>, window_params = [{transform_indices = @transform_0, window_bounds = array<i64: 8, 64>}, {transform_indices = @transform_1, window_bounds = array<i64: 8, 64>}, {pipeline_mode = #tpu.pipeline_mode<synchronous>, transform_indices = @transform_2, window_bounds = array<i64: 64, 128>}, {pipeline_mode = #tpu.pipeline_mode<synchronous>, transform_indices = @transform_3, window_bounds = array<i64: 64, 128>}, {pipeline_mode = #tpu.pipeline_mode<synchronous>, transform_indices = @transform_4, window_bounds = array<i64: 1, 128>}, {pipeline_mode = #tpu.pipeline_mode<synchronous>, transform_indices = @transform_5, window_bounds = array<i64: 128, 128>}, {pipeline_mode = #tpu.pipeline_mode<synchronous>, transform_indices = @transform_6, window_bounds = array<i64: 1, 128>}, {pipeline_mode = #tpu.pipeline_mode<synchronous>, transform_indices = @transform_7, window_bounds = array<i64: 128, 4>}, {pipeline_mode = #tpu.pipeline_mode<synchronous>, transform_indices = @transform_8, window_bounds = array<i64: 1, 4>}, {transform_indices = @transform_9, window_bounds = array<i64: 8, 4>}]} {
    %c0 = arith.constant 0 : index
    %c0_0 = arith.constant 0 : index
    %0 = vector.load %arg1[%c0, %c0_0] : memref<8x64xf32, #tpu.memory_space<vmem>>, vector<8x64xf32>
    %c0_1 = arith.constant 0 : index
    %c0_2 = arith.constant 0 : index
    %1 = vector.load %arg3[%c0_1, %c0_2] : memref<64x128xf32, #tpu.memory_space<vmem>>, vector<64x128xf32>
    %cst = arith.constant dense<0.000000e+00> : vector<8x128xf32>
    %2 = tpu.matmul %0, %1, %cst {dimension_numbers = #tpu.dot_dimension_numbers<[1], [0], [0], [1], [0, 0, 1, 1], [], []>} : vector<8x64xf32>, vector<64x128xf32>, vector<8x128xf32> -> vector<8x128xf32>
    %c0_3 = arith.constant 0 : index
    %c0_4 = arith.constant 0 : index
    %3 = vector.load %arg2[%c0_3, %c0_4] : memref<8x64xf32, #tpu.memory_space<vmem>>, vector<8x64xf32>
    %c0_5 = arith.constant 0 : index
    %c0_6 = arith.constant 0 : index
    %4 = vector.load %arg4[%c0_5, %c0_6] : memref<64x128xf32, #tpu.memory_space<vmem>>, vector<64x128xf32>
    %cst_7 = arith.constant dense<0.000000e+00> : vector<8x128xf32>
    %5 = tpu.matmul %3, %4, %cst_7 {dimension_numbers = #tpu.dot_dimension_numbers<[1], [0], [0], [1], [0, 0, 1, 1], [], []>} : vector<8x64xf32>, vector<64x128xf32>, vector<8x128xf32> -> vector<8x128xf32>
    %6 = arith.addf %2, %5 : vector<8x128xf32>
    %c0_8 = arith.constant 0 : index
    %c0_9 = arith.constant 0 : index
    %7 = vector.load %arg5[%c0_8, %c0_9] : memref<1x128xf32, #tpu.memory_space<vmem>>, vector<1x128xf32>
    %8 = vector.broadcast %7 : vector<1x128xf32> to vector<8x128xf32>
    %9 = arith.addf %6, %8 : vector<8x128xf32>
    %cst_10 = arith.constant 0.000000e+00 : f32
    %10 = vector.broadcast %cst_10 : f32 to vector<8x128xf32>
    %11 = arith.maximumf %9, %10 : vector<8x128xf32>
    %c0_11 = arith.constant 0 : index
    %c0_12 = arith.constant 0 : index
    %12 = vector.load %arg6[%c0_11, %c0_12] : memref<128x128xf32, #tpu.memory_space<vmem>>, vector<128x128xf32>
    %cst_13 = arith.constant dense<0.000000e+00> : vector<8x128xf32>
    %13 = tpu.matmul %11, %12, %cst_13 {dimension_numbers = #tpu.dot_dimension_numbers<[1], [0], [0], [1], [0, 0, 1, 1], [], []>} : vector<8x128xf32>, vector<128x128xf32>, vector<8x128xf32> -> vector<8x128xf32>
    %c0_14 = arith.constant 0 : index
    %c0_15 = arith.constant 0 : index
    %14 = vector.load %arg7[%c0_14, %c0_15] : memref<1x128xf32, #tpu.memory_space<vmem>>, vector<1x128xf32>
    %15 = vector.broadcast %14 : vector<1x128xf32> to vector<8x128xf32>
    %16 = arith.addf %13, %15 : vector<8x128xf32>
    %cst_16 = arith.constant 0.000000e+00 : f32
    %17 = vector.broadcast %cst_16 : f32 to vector<8x128xf32>
    %18 = arith.maximumf %16, %17 : vector<8x128xf32>
    %c0_17 = arith.constant 0 : index
    %c0_18 = arith.constant 0 : index
    %19 = vector.load %arg8[%c0_17, %c0_18] : memref<128x4xf32, #tpu.memory_space<vmem>>, vector<128x4xf32>
    %cst_19 = arith.constant dense<0.000000e+00> : vector<8x4xf32>
    %20 = tpu.matmul %18, %19, %cst_19 {dimension_numbers = #tpu.dot_dimension_numbers<[1], [0], [0], [1], [0, 0, 1, 1], [], []>} : vector<8x128xf32>, vector<128x4xf32>, vector<8x4xf32> -> vector<8x4xf32>
    %c0_20 = arith.constant 0 : index
    %c0_21 = arith.constant 0 : index
    %21 = vector.load %arg9[%c0_20, %c0_21] : memref<1x4xf32, #tpu.memory_space<vmem>>, vector<1x4xf32>
    %22 = vector.broadcast %21 : vector<1x4xf32> to vector<8x4xf32>
    %23 = arith.addf %20, %22 : vector<8x4xf32>
    %c0_22 = arith.constant 0 : index
    %c0_23 = arith.constant 0 : index
    %24 = vector.load %arg10[%c0_22, %c0_23] : memref<8x4xf32, #tpu.memory_space<vmem>>, vector<8x4xf32>
    tpu.vector_store %arg10[%c0_22, %c0_23], %23 {strides = array<i32>} : memref<8x4xf32, #tpu.memory_space<vmem>>, vector<8x4xf32>,
    return
  }
  func.func @transform_0(%arg0: i32) -> (i32, i32) {
    %c0_i32 = arith.constant 0 : i32
    %c0_i32_0 = arith.constant 0 : i32
    return %arg0, %c0_i32 : i32, i32
  }
  func.func @transform_1(%arg0: i32) -> (i32, i32) {
    %c0_i32 = arith.constant 0 : i32
    %c0_i32_0 = arith.constant 0 : i32
    return %arg0, %c0_i32 : i32, i32
  }
  func.func @transform_2(%arg0: i32) -> (i32, i32) {
    %c0_i32 = arith.constant 0 : i32
    %c0_i32_0 = arith.constant 0 : i32
    %c0_i32_1 = arith.constant 0 : i32
    return %c0_i32, %c0_i32_0 : i32, i32
  }
  func.func @transform_3(%arg0: i32) -> (i32, i32) {
    %c0_i32 = arith.constant 0 : i32
    %c0_i32_0 = arith.constant 0 : i32
    %c0_i32_1 = arith.constant 0 : i32
    return %c0_i32, %c0_i32_0 : i32, i32
  }
  func.func @transform_4(%arg0: i32) -> (i32, i32) {
    %c0_i32 = arith.constant 0 : i32
    %c0_i32_0 = arith.constant 0 : i32
    %c0_i32_1 = arith.constant 0 : i32
    return %c0_i32, %c0_i32_0 : i32, i32
  }
  func.func @transform_5(%arg0: i32) -> (i32, i32) {
    %c0_i32 = arith.constant 0 : i32
    %c0_i32_0 = arith.constant 0 : i32
    %c0_i32_1 = arith.constant 0 : i32
    return %c0_i32, %c0_i32_0 : i32, i32
  }
  func.func @transform_6(%arg0: i32) -> (i32, i32) {
    %c0_i32 = arith.constant 0 : i32
    %c0_i32_0 = arith.constant 0 : i32
    %c0_i32_1 = arith.constant 0 : i32
    return %c0_i32, %c0_i32_0 : i32, i32
  }
  func.func @transform_7(%arg0: i32) -> (i32, i32) {
    %c0_i32 = arith.constant 0 : i32
    %c0_i32_0 = arith.constant 0 : i32
    %c0_i32_1 = arith.constant 0 : i32
    return %c0_i32, %c0_i32_0 : i32, i32
  }
  func.func @transform_8(%arg0: i32) -> (i32, i32) {
    %c0_i32 = arith.constant 0 : i32
    %c0_i32_0 = arith.constant 0 : i32
    %c0_i32_1 = arith.constant 0 : i32
    return %c0_i32, %c0_i32_0 : i32, i32
  }
  func.func @transform_9(%arg0: i32) -> (i32, i32) {
    %c0_i32 = arith.constant 0 : i32
    %c0_i32_0 = arith.constant 0 : i32
    return %arg0, %c0_i32 : i32, i32
  }
}

</mosaic_0001>

<bundles_post_ra>
// kernel: global_discriminator_forward.1
= control target key start
LH: loop header
LB: loop body
LE: loop exit
PB: predicated region body
PF: predicated region fallthrough
CT: control target
= control target key end

     0   :  { %v639_v0 = vmov 0.0|0.0   ;;  %vm640_vm0 = vmmov 0   ;;  %v641_v8 = vmov 0.0   ;;  %vm50_vm1 = vcmask 523264   ;;  %s882_s3 = inlined_call_operand.vmem [shape: f32[64,128], index: 3, kind: input, shape index: {}]   ;;  %s883_s2 = inlined_call_operand.vmem [shape: f32[64,128], index: 2, kind: input, shape index: {}]   ;;  %s884_s5 = inlined_call_operand.vmem [shape: f32[128,128], index: 5, kind: input, shape index: {}]   ;;  %s885_s1 = inlined_call_operand.vmem [shape: f32[8,64], index: 1, kind: input, shape index: {}]   ;;  %s886_s0 = inlined_call_operand.vmem [shape: f32[8,64], index: 0, kind: input, shape index: {}]   ;;  %s887_s7 = inlined_call_operand.vmem [shape: f32[128,4], index: 7, kind: input, shape index: {}]   ;;  %s888_s4 = inlined_call_operand.vmem [shape: f32[1,128], index: 4, kind: input, shape index: {}]   ;;  %s889_s6 = inlined_call_operand.vmem [shape: f32[1,128], index: 6, kind: input, shape index: {}]   ;;  %s890_s8 = inlined_call_operand.vmem [shape: f32[1,4], index: 8, kind: input, shape index: {}]   ;;  %s891_s9 = inlined_call_operand.vmem [shape: f32[8,4], index: 9, kind: output, shape index: {}]  }
   0x1   :  { %564 = vmatprep.subr.bf16.mxu0 %v639_v0  ;;  %576 = vmatprep.subr.bf16.mxu1 %v639_v0  ;;  %v42_v1 = vld [vmem:[%s882_s3] sm:$0xff]  ;;  %v43_v2 = vld [vmem:[%s882_s3 + $0x8] sm:$0xff]  ;;  %v44_v6 = vld [vmem:[%s882_s3 + $0x10] sm:$0xff]  ;;  %vm393_vm2 = vcmask 31744  }
   0x2   :  { %v33_v3 = vld [vmem:[%s883_s2] sm:$0xff]  ;;  %v565_v4 = vpack.c.bf16 %v43_v2, %v42_v1  ;;  %v34_v5 = vld [vmem:[%s883_s2 + $0x8] sm:$0xff]  ;;  %v45_v7 = vld [vmem:[%s882_s3 + $0x18] sm:$0xff]  ;;  %472 = vmatprep.mubr.msk.f32.mxu0 %vm640_vm0, %v641_v8  ;;  %491 = vmatprep.mubr.msk.f32.mxu1 %vm640_vm0, %v641_v8 }
   0x3   :  { %v577_v9 = vpack.c.bf16 %v34_v5, %v33_v3  ;;  %v35_v10 = vld [vmem:[%s883_s2 + $0x10] sm:$0xff]  ;;  %v36_v11 = vld [vmem:[%s883_s2 + $0x18] sm:$0xff]  ;;  %v568_v12 = vpack.c.bf16 %v45_v7, %v44_v6  ;;  %v46_v14 = vld [vmem:[%s882_s3 + $0x20] sm:$0xff] }
   0x4   :  { %566 = vmatpush3.bf16.msra.mxu0 %v565_v4  ;;  %v580_v13 = vpack.c.bf16 %v36_v11, %v35_v10  ;;  %v47_v15 = vld [vmem:[%s882_s3 + $0x28] sm:$0xff]  ;;  %v37_v16 = vld [vmem:[%s883_s2 + $0x20] sm:$0xff]  ;;  %v48_v20 = vld [vmem:[%s882_s3 + $0x30] sm:$0xff] }
   0x5   :  { %578 = vmatpush3.bf16.msra.mxu1 %v577_v9  ;;  %567 = vmatprep.subr.bf16.mxu0 %v639_v0  ;;  %v38_v17 = vld [vmem:[%s883_s2 + $0x28] sm:$0xff]  ;;  %v571_v18 = vpack.c.bf16 %v47_v15, %v46_v14  ;;  %v49_v21 = vld [vmem:[%s882_s3 + $0x38] sm:$0xff]  ;;  %v39_v22 = vld [vmem:[%s883_s2 + $0x30] sm:$0xff] }
   0x6   :  { %579 = vmatprep.subr.bf16.mxu1 %v639_v0  ;;  %v583_v19 = vpack.c.bf16 %v38_v17, %v37_v16  ;;  %v40_v23 = vld [vmem:[%s883_s2 + $0x38] sm:$0xff]  ;;  %v574_v24 = vpack.c.bf16 %v49_v21, %v48_v20  ;;  %v206_v26 = vld [vmem:[%s884_s5] sm:$0xff]  ;;  %v207_v27 = vld [vmem:[%s884_s5 + $0x8] sm:$0xff] }
   0x7   :  { %v586_v25 = vpack.c.bf16 %v40_v23, %v39_v22  ;;  %v41_v28 = vld [vmem:[%s885_s1] sm:$0xff]  ;;  %v589_v29 = vpack.c.bf16 %v207_v27, %v206_v26  ;;  %v208_v31 = vld [vmem:[%s884_s5 + $0x10] sm:$0xff]  ;;  %v209_v32 = vld [vmem:[%s884_s5 + $0x18] sm:$0xff] }
   0x8   :  { %569 = vmatpush3.bf16.msra.mxu0 %v568_v12  ;;  %v32_v30 = vld [vmem:[%s886_s0] sm:$0xff]  ;;  %v592_v33 = vpack.c.bf16 %v209_v32, %v208_v31  ;;  %v211_v35 = vld [vmem:[%s884_s5 + $0x28] sm:$0xff]  ;;  %v212_v37 = vld [vmem:[%s884_s5 + $0x30] sm:$0xff] }
   0x9   :  { %581 = vmatpush3.bf16.msra.mxu1 %v580_v13  ;;  %570 = vmatprep.subr.bf16.mxu0 %v639_v0  ;;  %v210_v34 = vld [vmem:[%s884_s5 + $0x20] sm:$0xff]  ;;  %v213_v38 = vld [vmem:[%s884_s5 + $0x38] sm:$0xff]  ;;  %v215_v41 = vld [vmem:[%s884_s5 + $0x48] sm:$0xff] }
   0xa   :  { %582 = vmatprep.subr.bf16.mxu1 %v639_v0  ;;  %v595_v36 = vpack.c.bf16 %v211_v35, %v210_v34  ;;  %v598_v39 = vpack.c.bf16 %v213_v38, %v212_v37  ;;  %v214_v40 = vld [vmem:[%s884_s5 + $0x40] sm:$0xff]  ;;  %v216_v43 = vld [vmem:[%s884_s5 + $0x50] sm:$0xff]  ;;  %v217_v44 = vld [vmem:[%s884_s5 + $0x58] sm:$0xff] }
   0xb   :  { %v601_v42 = vpack.c.bf16 %v215_v41, %v214_v40  ;;  %v604_v45 = vpack.c.bf16 %v217_v44, %v216_v43  ;;  %v218_v46 = vld [vmem:[%s884_s5 + $0x60] sm:$0xff]  ;;  %v219_v47 = vld [vmem:[%s884_s5 + $0x68] sm:$0xff]  ;;  %v220_v49 = vld [vmem:[%s884_s5 + $0x70] sm:$0xff] }
   0xc   :  { %572 = vmatpush3.bf16.msra.mxu0 %v571_v18  ;;  %v607_v48 = vpack.c.bf16 %v219_v47, %v218_v46  ;;  %v221_v50 = vld [vmem:[%s884_s5 + $0x78] sm:$0xff]  ;;  %v300_v52 = vld [vmem:[%s887_s7] sm:$0xff]  ;;  %v301_v53 = vld [vmem:[%s887_s7 + $0x8] sm:$0xff] }
   0xd   :  { %584 = vmatpush3.bf16.msra.mxu1 %v583_v19  ;;  %573 = vmatprep.subr.bf16.mxu0 %v639_v0  ;;  %v610_v51 = vpack.c.bf16 %v221_v50, %v220_v49  ;;  %v302_v54 = vld [vmem:[%s887_s7 + $0x10] sm:$0xff]  ;;  %v613_v55 = vpack.c.bf16 %v301_v53, %v300_v52  ;;  %v303_v56 = vld [vmem:[%s887_s7 + $0x18] sm:$0xff]  ;;  %v304_v58 = vld [vmem:[%s887_s7 + $0x20] sm:$0xff] }
   0xe   :  { %585 = vmatprep.subr.bf16.mxu1 %v639_v0  ;;  %v616_v57 = vpack.c.bf16 %v303_v56, %v302_v54  ;;  %v305_v59 = vld [vmem:[%s887_s7 + $0x28] sm:$0xff]  ;;  %v306_v61 = vld [vmem:[%s887_s7 + $0x30] sm:$0xff]  ;;  %v307_v62 = vld [vmem:[%s887_s7 + $0x38] sm:$0xff] }
   0xf   :  { %v619_v60 = vpack.c.bf16 %v305_v59, %v304_v58  ;;  %v622_v63 = vpack.c.bf16 %v307_v62, %v306_v61  ;;  %v308_v1 = vld [vmem:[%s887_s7 + $0x40] sm:$0xff]  ;;  %v309_v2 = vld [vmem:[%s887_s7 + $0x48] sm:$0xff]  ;;  %v310_v4 = vld [vmem:[%s887_s7 + $0x50] sm:$0xff] }
  0x10   :  { %575 = vmatpush3.bf16.msra.mxu0 %v574_v24  ;;  %v625_v3 = vpack.c.bf16 %v309_v2, %v308_v1  ;;  %v311_v5 = vld [vmem:[%s887_s7 + $0x58] sm:$0xff]  ;;  %v312_v7 = vld [vmem:[%s887_s7 + $0x60] sm:$0xff]  ;;  %v314_v18 = vld [vmem:[%s887_s7 + $0x70] sm:$0xff] }
  0x11   :  { %587 = vmatpush3.bf16.msra.mxu1 %v586_v25  ;;  %588 = vmatprep.subr.bf16.mxu0 %v639_v0  ;;  %v628_v6 = vpack.c.bf16 %v311_v5, %v310_v4  ;;  %v401_v12 = vld [vmem:[%s888_s4] ss:$0 sm:$0xff] }
  0x12   :  { %612 = vmatprep.subr.bf16.mxu1 %v639_v0  ;;  %v402_v20 = vld [vmem:[%s889_s6] ss:$0 sm:$0xff] }
  0x13   :  { %473 = vmatmul.mubr.msk.f32.vlgmr.msra.gmra.mrb[0].mxu0 %vm50_vm1, %v41_v28  ;;  %v403_v25 = vld [vmem:[%s890_s8] ss:$0 sm:$0xff] }
  0x14   :  { %492 = vmatmul.mubr.msk.f32.vlgmr.msra.gmra.mrb[0].mxu1 %vm50_vm1, %v32_v30  ;;  %590 = vmatpush3.bf16.msra.mxu0 %v589_v29 }
  0x15   :  { %591 = vmatprep.subr.bf16.mxu0 %v639_v0  ;;  %526 = vmatprep.mubr.msk.f32.mxu0 %vm640_vm0, %v641_v8 }
  0x16   :  { %561 = vmatprep.mubr.msk.f32.mxu1 %vm640_vm0, %v641_v8  ;;  %614 = vmatpush3.bf16.msra.mxu1 %v613_v55  ;;  %v313_v8 = vld [vmem:[%s887_s7 + $0x68] sm:$0xff] }
  0x17   :  { %615 = vmatprep.subr.bf16.mxu1 %v639_v0  ;;  %v631_v9 = vpack.c.bf16 %v313_v8, %v312_v7 }
  0x18   :  { %593 = vmatpush3.bf16.msra.mxu0 %v592_v33 }
  0x19   :  { %594 = vmatprep.subr.bf16.mxu0 %v639_v0 }
  0x1a   :  { %617 = vmatpush3.bf16.msra.mxu1 %v616_v57 }
  0x1b   :  { %618 = vmatprep.subr.bf16.mxu1 %v639_v0 }
  0x1c   :  { %596 = vmatpush3.bf16.msra.mxu0 %v595_v36 }
  0x1d   :  { %597 = vmatprep.subr.bf16.mxu0 %v639_v0 }
  0x1e   :  { %620 = vmatpush3.bf16.msra.mxu1 %v619_v60 }
  0x1f   :  { %621 = vmatprep.subr.bf16.mxu1 %v639_v0 }
  0x20   :  { %599 = vmatpush3.bf16.msra.mxu0 %v598_v39 }
  0x21   :  { %600 = vmatprep.subr.bf16.mxu0 %v639_v0 }
  0x22   :  { %623 = vmatpush3.bf16.msra.mxu1 %v622_v63 }
  0x23   :  { %624 = vmatprep.subr.bf16.mxu1 %v639_v0 }
  0x24   :  { %602 = vmatpush3.bf16.msra.mxu0 %v601_v42 }
  0x25   :  { %603 = vmatprep.subr.bf16.mxu0 %v639_v0 }
  0x26   :  { %626 = vmatpush3.bf16.msra.mxu1 %v625_v3 }
  0x27   :  { %627 = vmatprep.subr.bf16.mxu1 %v639_v0 }
  0x28   :  { %605 = vmatpush3.bf16.msra.mxu0 %v604_v45 }
  0x29   :  { %606 = vmatprep.subr.bf16.mxu0 %v639_v0 }
  0x2a   :  { %629 = vmatpush3.bf16.msra.mxu1 %v628_v6 }
  0x2b   :  { %630 = vmatprep.subr.bf16.mxu1 %v639_v0 }
  0x2c   :  { %608 = vmatpush3.bf16.msra.mxu0 %v607_v48 }
  0x2d   :  { %609 = vmatprep.subr.bf16.mxu0 %v639_v0 }
  0x2e   :  { %632 = vmatpush3.bf16.msra.mxu1 %v631_v9 }
  0x2f   :  { %633 = vmatprep.subr.bf16.mxu1 %v639_v0  ;;  %v315_v0 = vld [vmem:[%s887_s7 + $0x78] sm:$0xff] }
  0x30   :  { %611 = vmatpush3.bf16.msra.mxu0 %v610_v51  ;;  %v634_v19 = vpack.c.bf16 %v315_v0, %v314_v18 }
  0x32   :  { %635 = vmatpush3.bf16.msra.mxu1 %v634_v19 }
  0xe6   :  { %v120_v10 = vpop.f32.mrb[0].mxu0 }
  0xe7   :  { %v193_v11 = vpop.f32.mrb[0].mxu1  ;;  %v474_v13 = vpop.f32.mrb[1].mxu0 }
  0xe8   :  { %v194_v14 = vadd.f32 %v193_v11, %v120_v10  ;;  %v493_v15 = vpop.f32.mrb[1].mxu1 }
  0xea   :  { %v204_v16 = vadd.f32 %v401_v12, %v194_v14 }
  0xec   :  { %v205_v17 = vmax.f32 %v204_v16, 0.0 }
  0xee   :  { %527 = vmatmul.mubr.f32.vlgmr.msra.gmra.mrb[2].mxu0 %v205_v17 }
 0x1c1   :  { %v295_v21 = vpop.f32.mrb[2].mxu0 }
 0x1c2   :  { %v296_v22 = vadd.f32 %v402_v20, %v295_v21  ;;  %v528_v23 = vpop.f32.mrb[3].mxu0 }
 0x1c4   :  { %v299_v24 = vmax.f32 %v296_v22, 0.0 }
 0x1c6   :  { %562 = vmatmul.mubr.f32.vlgmr.msra.gmra.mrb[2].mxu1 %v299_v24 }
 0x299   :  { %v389_v26 = vpop.f32.mrb[2].mxu1 }
 0x29a   :  { %v390_v27 = vadd.f32 %v403_v25, %v389_v26  ;;  %v563_v28 = vpop.f32.mrb[3].mxu1 }
 0x29c   :  { %394 = vst.msk [vmem:[%s891_s9] sm:$0xff] %vm393_vm2, %v390_v27 }

</bundles_post_ra>
